<compile_context>
chip_gen: v7x
topology: tpu7x:2x2x1
jax: 0.10.0
libtpu: 0.0.40
codegen_flags: <defaults>
</compile_context>

<pallas_src>
import functools

import jax
import jax.numpy as jnp
from jax.experimental import pallas as pl
from jax.experimental.pallas import tpu as pltpu


def _round_up(x, m):
    return (x + m - 1) // m * m


# ----------------------------- Pallas kernel --------------------------------
def _transd_kernel(ph_e_ref, pt_e_ref, pr_e_ref, ph_pj_ref, pt_pj_ref, pr_pj_ref,
                   nh_e_ref, nt_e_ref, nr_e_ref, nh_pj_ref, nt_pj_ref, nr_pj_ref,
                   proj_out_ref, score_ref, *, l1_flag):
    def project(e, e_proj, r_proj):
        # e + <e, e_proj> * r_proj  (dot over the lane axis, broadcast back).
        return e + jnp.sum(e * e_proj, axis=-1, keepdims=True) * r_proj

    # Read each relation-projection tile once, reuse for both h and t.
    pr_pj = pr_pj_ref[...]
    nr_pj = nr_pj_ref[...]

    ph = project(ph_e_ref[...], ph_pj_ref[...], pr_pj)
    pt = project(pt_e_ref[...], pt_pj_ref[...], pr_pj)
    nh = project(nh_e_ref[...], nh_pj_ref[...], nr_pj)
    nt = project(nt_e_ref[...], nt_pj_ref[...], nr_pj)

    # Lane-dense store: all four projected embeddings in one (TB, 4*D) slab.
    proj_out_ref[...] = jnp.concatenate([ph, pt, nh, nt], axis=-1)

    pos_d = ph + pr_e_ref[...] - pt
    neg_d = nh + nr_e_ref[...] - nt
    if l1_flag:
        pos = jnp.sum(jnp.abs(pos_d), axis=-1, keepdims=True)
        neg = jnp.sum(jnp.abs(neg_d), axis=-1, keepdims=True)
    else:
        pos = jnp.sum(pos_d * pos_d, axis=-1, keepdims=True)
        neg = jnp.sum(neg_d * neg_d, axis=-1, keepdims=True)
    score_ref[...] = jnp.concatenate([pos, neg], axis=-1)   # (TB, 2)


def transd_pallas(gathered, *, l1_flag, block_rows):
    """gathered: 12 f32 arrays of shape (B_pad, D). Returns (proj_out, scores)."""
    b_pad, d = gathered[0].shape
    tb = block_rows
    assert tb % 8 == 0 and b_pad % tb == 0, (b_pad, tb)

    kernel = functools.partial(_transd_kernel, l1_flag=l1_flag)
    return pl.pallas_call(
        kernel,
        out_shape=(jax.ShapeDtypeStruct((b_pad, 4 * d), jnp.float32),
                   jax.ShapeDtypeStruct((b_pad, 2), jnp.float32)),
        grid=(pl.cdiv(b_pad, tb),),
        in_specs=[pl.BlockSpec((tb, d), lambda i: (i, 0)) for _ in range(12)],
        out_specs=(pl.BlockSpec((tb, 4 * d), lambda i: (i, 0)),
                   pl.BlockSpec((tb, 2), lambda i: (i, 0))),
        compiler_params=pltpu.CompilerParams(
            dimension_semantics=("parallel",)),
    )(*gathered)


def _pick_block_rows(batch, d):
    # Keep one pipeline buffer set (12 inputs + 2 outputs) around ~4 MiB so the
    # double-buffered working set stays well below the scoped-VMEM defaults on
    # v5e/v6e (16-32 MiB of 128 MiB) and v7x (32 MiB of 64 MiB).
    bytes_per_row = (12 * d + 4 * d + 2) * 4
    tb = (4 * 1024 * 1024) // bytes_per_row
    tb = max(8, min(512, (tb // 8) * 8))
    return min(tb, _round_up(batch, 8))


# --------------------------- model + JAX glue --------------------------------
class TransDSameSizeParams:
    """Deterministic synthetic parameters mirroring TransDPretrainModelSameSize.__init__."""

    def __init__(self, key, entity_total, relation_total, embedding_size):
        k1, k2, k3, k4 = jax.random.split(key, 4)
        # TODO(synk): the original module loads pretrained TransE entity/relation
        # embeddings from a pickle file and zero-initialises both projection
        # tables; here we use deterministic random values so the projection term
        # of the forward pass is actually exercised.
        self.ent_embeddings = jax.random.normal(
            k1, (entity_total, embedding_size), jnp.float32)
        self.rel_embeddings = jax.random.normal(
            k2, (relation_total, embedding_size), jnp.float32)
        self.ent_proj_embeddings = 0.1 * jax.random.normal(
            k3, (entity_total, embedding_size), jnp.float32)
        self.rel_proj_embeddings = 0.1 * jax.random.normal(
            k4, (relation_total, embedding_size), jnp.float32)
        self.embedding_size = embedding_size


def transd_forward(params, pos_h, pos_t, pos_r, neg_h, neg_t, neg_r,
                   *, l1_flag=True, block_rows=None):
    d = params.embedding_size
    b = pos_h.shape[0]
    tb = _pick_block_rows(b, d) if block_rows is None else _round_up(block_rows, 8)
    b_pad = _round_up(b, tb)

    def pad_idx(idx):
        return jnp.pad(idx, (0, b_pad - b))      # index 0 is always valid

    ph_i, pt_i, pr_i, nh_i, nt_i, nr_i = map(
        pad_idx, (pos_h, pos_t, pos_r, neg_h, neg_t, neg_r))

    ent, rel = params.ent_embeddings, params.rel_embeddings
    ent_pj, rel_pj = params.ent_proj_embeddings, params.rel_proj_embeddings
    gathered = (
        jnp.take(ent, ph_i, axis=0), jnp.take(ent, pt_i, axis=0),
        jnp.take(rel, pr_i, axis=0),
        jnp.take(ent_pj, ph_i, axis=0), jnp.take(ent_pj, pt_i, axis=0),
        jnp.take(rel_pj, pr_i, axis=0),
        jnp.take(ent, nh_i, axis=0), jnp.take(ent, nt_i, axis=0),
        jnp.take(rel, nr_i, axis=0),
        jnp.take(ent_pj, nh_i, axis=0), jnp.take(ent_pj, nt_i, axis=0),
        jnp.take(rel_pj, nr_i, axis=0),
    )

    proj_out, scores = transd_pallas(gathered, l1_flag=l1_flag, block_rows=tb)

    pos = scores[:b, 0]
    neg = scores[:b, 1]
    pos_h_e = proj_out[:b, 0 * d:1 * d]
    pos_t_e = proj_out[:b, 1 * d:2 * d]
    neg_h_e = proj_out[:b, 2 * d:3 * d]
    neg_t_e = proj_out[:b, 3 * d:4 * d]
    return pos, neg, pos_h_e, pos_t_e, neg_h_e, neg_t_e


def transd_reference(params, pos_h, pos_t, pos_r, neg_h, neg_t, neg_r,
                     *, l1_flag=True):
    def project(e, e_proj, r_proj):
        return e + jnp.sum(e * e_proj, axis=1, keepdims=True) * r_proj

    ph_e = params.ent_embeddings[pos_h]
    pt_e = params.ent_embeddings[pos_t]
    pr_e = params.rel_embeddings[pos_r]
    ph_pj = params.ent_proj_embeddings[pos_h]
    pt_pj = params.ent_proj_embeddings[pos_t]
    pr_pj = params.rel_proj_embeddings[pos_r]
    nh_e = params.ent_embeddings[neg_h]
    nt_e = params.ent_embeddings[neg_t]
    nr_e = params.rel_embeddings[neg_r]
    nh_pj = params.ent_proj_embeddings[neg_h]
    nt_pj = params.ent_proj_embeddings[neg_t]
    nr_pj = params.rel_proj_embeddings[neg_r]

    ph = project(ph_e, ph_pj, pr_pj)
    pt = project(pt_e, pt_pj, pr_pj)
    nh = project(nh_e, nh_pj, nr_pj)
    nt = project(nt_e, nt_pj, nr_pj)

    if l1_flag:
        pos = jnp.sum(jnp.abs(ph + pr_e - pt), axis=1)
        neg = jnp.sum(jnp.abs(nh + nr_e - nt), axis=1)
    else:
        pos = jnp.sum((ph + pr_e - pt) ** 2, axis=1)
        neg = jnp.sum((nh + nr_e - nt) ** 2, axis=1)
    return pos, neg, ph, pt, nh, nt


# --------------------------------- main --------------------------------------
if __name__ == "__main__":
    key = jax.random.PRNGKey(0)
    kp, ki = jax.random.split(key)

    entity_total = 16
    relation_total = 8
    embedding_size = 32
    batch = 13          # deliberately not a multiple of the batch tile

    params = TransDSameSizeParams(kp, entity_total, relation_total, embedding_size)

    k1, k2, k3, k4, k5, k6 = jax.random.split(ki, 6)
    pos_h = jax.random.randint(k1, (batch,), 0, entity_total, jnp.int32)
    pos_t = jax.random.randint(k2, (batch,), 0, entity_total, jnp.int32)
    pos_r = jax.random.randint(k3, (batch,), 0, relation_total, jnp.int32)
    neg_h = jax.random.randint(k4, (batch,), 0, entity_total, jnp.int32)
    neg_t = jax.random.randint(k5, (batch,), 0, entity_total, jnp.int32)
    neg_r = jax.random.randint(k6, (batch,), 0, relation_total, jnp.int32)

    for l1_flag in (True, False):
        out = transd_forward(params, pos_h, pos_t, pos_r, neg_h, neg_t, neg_r,
                             l1_flag=l1_flag, block_rows=8)  # 2-step pipelined grid
        out = jax.block_until_ready(out)
        ref = transd_reference(params, pos_h, pos_t, pos_r, neg_h, neg_t, neg_r,
                               l1_flag=l1_flag)
        for o, r in zip(out, ref):
            assert o.shape == r.shape, (o.shape, r.shape)
            assert jnp.allclose(o, r, atol=1e-5, rtol=1e-5), \
                float(jnp.max(jnp.abs(o - r)))

    print("KERNEL_OK")
</pallas_src>

<mosaic_0001>
module attributes {stable_mosaic.version = 11 : i64} {
  func.func @_transd_kernel(%arg0: i32, %arg1: memref<8x32xf32, #tpu.memory_space<vmem>>, %arg2: memref<8x32xf32, #tpu.memory_space<vmem>>, %arg3: memref<8x32xf32, #tpu.memory_space<vmem>>, %arg4: memref<8x32xf32, #tpu.memory_space<vmem>>, %arg5: memref<8x32xf32, #tpu.memory_space<vmem>>, %arg6: memref<8x32xf32, #tpu.memory_space<vmem>>, %arg7: memref<8x32xf32, #tpu.memory_space<vmem>>, %arg8: memref<8x32xf32, #tpu.memory_space<vmem>>, %arg9: memref<8x32xf32, #tpu.memory_space<vmem>>, %arg10: memref<8x32xf32, #tpu.memory_space<vmem>>, %arg11: memref<8x32xf32, #tpu.memory_space<vmem>>, %arg12: memref<8x32xf32, #tpu.memory_space<vmem>>, %arg13: memref<8x128xf32, #tpu.memory_space<vmem>>, %arg14: memref<8x2xf32, #tpu.memory_space<vmem>>) attributes {dimension_semantics = [#tpu.dimension_semantics<parallel>], iteration_bounds = array<i64: 2>, scalar_prefetch = 0 : i64, scratch_operands = 0 : i64, tpu.core_type = #tpu.core_type<tc>, window_params = [{transform_indices = @transform_0, window_bounds = array<i64: 8, 32>}, {transform_indices = @transform_1, window_bounds = array<i64: 8, 32>}, {transform_indices = @transform_2, window_bounds = array<i64: 8, 32>}, {transform_indices = @transform_3, window_bounds = array<i64: 8, 32>}, {transform_indices = @transform_4, window_bounds = array<i64: 8, 32>}, {transform_indices = @transform_5, window_bounds = array<i64: 8, 32>}, {transform_indices = @transform_6, window_bounds = array<i64: 8, 32>}, {transform_indices = @transform_7, window_bounds = array<i64: 8, 32>}, {transform_indices = @transform_8, window_bounds = array<i64: 8, 32>}, {transform_indices = @transform_9, window_bounds = array<i64: 8, 32>}, {transform_indices = @transform_10, window_bounds = array<i64: 8, 32>}, {transform_indices = @transform_11, window_bounds = array<i64: 8, 32>}, {transform_indices = @transform_12, window_bounds = array<i64: 8, 128>}, {transform_indices = @transform_13, window_bounds = array<i64: 8, 2>}]} {
    %c0 = arith.constant 0 : index
    %c0_0 = arith.constant 0 : index
    %0 = vector.load %arg6[%c0, %c0_0] : memref<8x32xf32, #tpu.memory_space<vmem>>, vector<8x32xf32>
    %c0_1 = arith.constant 0 : index
    %c0_2 = arith.constant 0 : index
    %1 = vector.load %arg12[%c0_1, %c0_2] : memref<8x32xf32, #tpu.memory_space<vmem>>, vector<8x32xf32>
    %c0_3 = arith.constant 0 : index
    %c0_4 = arith.constant 0 : index
    %2 = vector.load %arg1[%c0_3, %c0_4] : memref<8x32xf32, #tpu.memory_space<vmem>>, vector<8x32xf32>
    %c0_5 = arith.constant 0 : index
    %c0_6 = arith.constant 0 : index
    %3 = vector.load %arg4[%c0_5, %c0_6] : memref<8x32xf32, #tpu.memory_space<vmem>>, vector<8x32xf32>
    %4 = arith.mulf %2, %3 : vector<8x32xf32>
    %cst = arith.constant dense<0.000000e+00> : vector<8xf32>
    %5 = vector.multi_reduction <add>, %4, %cst [1] : vector<8x32xf32> to vector<8xf32>
    %6 = vector.shape_cast %5 : vector<8xf32> to vector<8x1xf32>
    %7 = vector.broadcast %6 : vector<8x1xf32> to vector<8x32xf32>
    %8 = arith.mulf %7, %0 : vector<8x32xf32>
    %9 = arith.addf %2, %8 : vector<8x32xf32>
    %c0_7 = arith.constant 0 : index
    %c0_8 = arith.constant 0 : index
    %10 = vector.load %arg2[%c0_7, %c0_8] : memref<8x32xf32, #tpu.memory_space<vmem>>, vector<8x32xf32>
    %c0_9 = arith.constant 0 : index
    %c0_10 = arith.constant 0 : index
    %11 = vector.load %arg5[%c0_9, %c0_10] : memref<8x32xf32, #tpu.memory_space<vmem>>, vector<8x32xf32>
    %12 = arith.mulf %10, %11 : vector<8x32xf32>
    %cst_11 = arith.constant dense<0.000000e+00> : vector<8xf32>
    %13 = vector.multi_reduction <add>, %12, %cst_11 [1] : vector<8x32xf32> to vector<8xf32>
    %14 = vector.shape_cast %13 : vector<8xf32> to vector<8x1xf32>
    %15 = vector.broadcast %14 : vector<8x1xf32> to vector<8x32xf32>
    %16 = arith.mulf %15, %0 : vector<8x32xf32>
    %17 = arith.addf %10, %16 : vector<8x32xf32>
    %c0_12 = arith.constant 0 : index
    %c0_13 = arith.constant 0 : index
    %18 = vector.load %arg7[%c0_12, %c0_13] : memref<8x32xf32, #tpu.memory_space<vmem>>, vector<8x32xf32>
    %c0_14 = arith.constant 0 : index
    %c0_15 = arith.constant 0 : index
    %19 = vector.load %arg10[%c0_14, %c0_15] : memref<8x32xf32, #tpu.memory_space<vmem>>, vector<8x32xf32>
    %20 = arith.mulf %18, %19 : vector<8x32xf32>
    %cst_16 = arith.constant dense<0.000000e+00> : vector<8xf32>
    %21 = vector.multi_reduction <add>, %20, %cst_16 [1] : vector<8x32xf32> to vector<8xf32>
    %22 = vector.shape_cast %21 : vector<8xf32> to vector<8x1xf32>
    %23 = vector.broadcast %22 : vector<8x1xf32> to vector<8x32xf32>
    %24 = arith.mulf %23, %1 : vector<8x32xf32>
    %25 = arith.addf %18, %24 : vector<8x32xf32>
    %c0_17 = arith.constant 0 : index
    %c0_18 = arith.constant 0 : index
    %26 = vector.load %arg8[%c0_17, %c0_18] : memref<8x32xf32, #tpu.memory_space<vmem>>, vector<8x32xf32>
    %c0_19 = arith.constant 0 : index
    %c0_20 = arith.constant 0 : index
    %27 = vector.load %arg11[%c0_19, %c0_20] : memref<8x32xf32, #tpu.memory_space<vmem>>, vector<8x32xf32>
    %28 = arith.mulf %26, %27 : vector<8x32xf32>
    %cst_21 = arith.constant dense<0.000000e+00> : vector<8xf32>
    %29 = vector.multi_reduction <add>, %28, %cst_21 [1] : vector<8x32xf32> to vector<8xf32>
    %30 = vector.shape_cast %29 : vector<8xf32> to vector<8x1xf32>
    %31 = vector.broadcast %30 : vector<8x1xf32> to vector<8x32xf32>
    %32 = arith.mulf %31, %1 : vector<8x32xf32>
    %33 = arith.addf %26, %32 : vector<8x32xf32>
    %34 = tpu.concatenate %9, %17, %25, %33 in 1 : vector<8x32xf32>, vector<8x32xf32>, vector<8x32xf32>, vector<8x32xf32> -> vector<8x128xf32>
    %c0_22 = arith.constant 0 : index
    %c0_23 = arith.constant 0 : index
    %35 = vector.load %arg13[%c0_22, %c0_23] : memref<8x128xf32, #tpu.memory_space<vmem>>, vector<8x128xf32>
    tpu.vector_store %arg13[%c0_22, %c0_23], %34 {strides = array<i32>} : memref<8x128xf32, #tpu.memory_space<vmem>>, vector<8x128xf32>,
    %c0_24 = arith.constant 0 : index
    %c0_25 = arith.constant 0 : index
    %36 = vector.load %arg3[%c0_24, %c0_25] : memref<8x32xf32, #tpu.memory_space<vmem>>, vector<8x32xf32>
    %37 = arith.addf %9, %36 : vector<8x32xf32>
    %38 = arith.subf %37, %17 : vector<8x32xf32>
    %c0_26 = arith.constant 0 : index
    %c0_27 = arith.constant 0 : index
    %39 = vector.load %arg9[%c0_26, %c0_27] : memref<8x32xf32, #tpu.memory_space<vmem>>, vector<8x32xf32>
    %40 = arith.addf %25, %39 : vector<8x32xf32>
    %41 = arith.subf %40, %33 : vector<8x32xf32>
    %42 = math.absf %38 : vector<8x32xf32>
    %cst_28 = arith.constant dense<0.000000e+00> : vector<8xf32>
    %43 = vector.multi_reduction <add>, %42, %cst_28 [1] : vector<8x32xf32> to vector<8xf32>
    %44 = vector.shape_cast %43 : vector<8xf32> to vector<8x1xf32>
    %45 = math.absf %41 : vector<8x32xf32>
    %cst_29 = arith.constant dense<0.000000e+00> : vector<8xf32>
    %46 = vector.multi_reduction <add>, %45, %cst_29 [1] : vector<8x32xf32> to vector<8xf32>
    %47 = vector.shape_cast %46 : vector<8xf32> to vector<8x1xf32>
    %48 = tpu.concatenate %44, %47 in 1 : vector<8x1xf32>, vector<8x1xf32> -> vector<8x2xf32>
    %c0_30 = arith.constant 0 : index
    %c0_31 = arith.constant 0 : index
    %49 = vector.load %arg14[%c0_30, %c0_31] : memref<8x2xf32, #tpu.memory_space<vmem>>, vector<8x2xf32>
    tpu.vector_store %arg14[%c0_30, %c0_31], %48 {strides = array<i32>} : memref<8x2xf32, #tpu.memory_space<vmem>>, vector<8x2xf32>,
    return
  }
  func.func @transform_0(%arg0: i32) -> (i32, i32) {
    %c0_i32 = arith.constant 0 : i32
    %c0_i32_0 = arith.constant 0 : i32
    return %arg0, %c0_i32 : i32, i32
  }
  func.func @transform_1(%arg0: i32) -> (i32, i32) {
    %c0_i32 = arith.constant 0 : i32
    %c0_i32_0 = arith.constant 0 : i32
    return %arg0, %c0_i32 : i32, i32
  }
  func.func @transform_2(%arg0: i32) -> (i32, i32) {
    %c0_i32 = arith.constant 0 : i32
    %c0_i32_0 = arith.constant 0 : i32
    return %arg0, %c0_i32 : i32, i32
  }
  func.func @transform_3(%arg0: i32) -> (i32, i32) {
    %c0_i32 = arith.constant 0 : i32
    %c0_i32_0 = arith.constant 0 : i32
    return %arg0, %c0_i32 : i32, i32
  }
  func.func @transform_4(%arg0: i32) -> (i32, i32) {
    %c0_i32 = arith.constant 0 : i32
    %c0_i32_0 = arith.constant 0 : i32
    return %arg0, %c0_i32 : i32, i32
  }
  func.func @transform_5(%arg0: i32) -> (i32, i32) {
    %c0_i32 = arith.constant 0 : i32
    %c0_i32_0 = arith.constant 0 : i32
    return %arg0, %c0_i32 : i32, i32
  }
  func.func @transform_6(%arg0: i32) -> (i32, i32) {
    %c0_i32 = arith.constant 0 : i32
    %c0_i32_0 = arith.constant 0 : i32
    return %arg0, %c0_i32 : i32, i32
  }
  func.func @transform_7(%arg0: i32) -> (i32, i32) {
    %c0_i32 = arith.constant 0 : i32
    %c0_i32_0 = arith.constant 0 : i32
    return %arg0, %c0_i32 : i32, i32
  }
  func.func @transform_8(%arg0: i32) -> (i32, i32) {
    %c0_i32 = arith.constant 0 : i32
    %c0_i32_0 = arith.constant 0 : i32
    return %arg0, %c0_i32 : i32, i32
  }
  func.func @transform_9(%arg0: i32) -> (i32, i32) {
    %c0_i32 = arith.constant 0 : i32
    %c0_i32_0 = arith.constant 0 : i32
    return %arg0, %c0_i32 : i32, i32
  }
  func.func @transform_10(%arg0: i32) -> (i32, i32) {
    %c0_i32 = arith.constant 0 : i32
    %c0_i32_0 = arith.constant 0 : i32
    return %arg0, %c0_i32 : i32, i32
  }
  func.func @transform_11(%arg0: i32) -> (i32, i32) {
    %c0_i32 = arith.constant 0 : i32
    %c0_i32_0 = arith.constant 0 : i32
    return %arg0, %c0_i32 : i32, i32
  }
  func.func @transform_12(%arg0: i32) -> (i32, i32) {
    %c0_i32 = arith.constant 0 : i32
    %c0_i32_0 = arith.constant 0 : i32
    return %arg0, %c0_i32 : i32, i32
  }
  func.func @transform_13(%arg0: i32) -> (i32, i32) {
    %c0_i32 = arith.constant 0 : i32
    %c0_i32_0 = arith.constant 0 : i32
    return %arg0, %c0_i32 : i32, i32
  }
}

</mosaic_0001>

<bundles_post_ra>
// kernel: tpu_custom_call.1
= control target key start
LH: loop header
LB: loop body
LE: loop exit
PB: predicated region body
PF: predicated region fallthrough
CT: control target
= control target key end

     0   :  { %s2318_s0 = inlined_call_operand.hbm [shape: f32[16,32], index: 0, kind: input, shape index: {}]   ;;  %s2319_s1 = inlined_call_operand.hbm [shape: f32[16,32], index: 1, kind: input, shape index: {}]   ;;  %s2320_s2 = inlined_call_operand.hbm [shape: f32[16,32], index: 2, kind: input, shape index: {}]   ;;  %s2321_s3 = inlined_call_operand.hbm [shape: f32[16,32], index: 3, kind: input, shape index: {}]   ;;  %s2322_s4 = inlined_call_operand.hbm [shape: f32[16,32], index: 4, kind: input, shape index: {}]   ;;  %s2323_s5 = inlined_call_operand.vmem [shape: f32[16,32], index: 5, kind: input, shape index: {}]   ;;  %s2324_s6 = inlined_call_operand.hbm [shape: f32[16,32], index: 6, kind: input, shape index: {}]   ;;  %s2325_s7 = inlined_call_operand.hbm [shape: f32[16,32], index: 7, kind: input, shape index: {}]   ;;  %s2326_s8 = inlined_call_operand.hbm [shape: f32[16,32], index: 8, kind: input, shape index: {}]   ;;  %s2327_s9 = inlined_call_operand.vmem [shape: f32[16,32], index: 9, kind: input, shape index: {}]   ;;  %s2328_s10 = inlined_call_operand.hbm [shape: f32[16,32], index: 10, kind: input, shape index: {}]   ;;  %s2329_s11 = inlined_call_operand.hbm [shape: f32[16,32], index: 11, kind: input, shape index: {}]   ;;  %s2330_s12 = inlined_call_operand.hbm [shape: f32[16,128], index: 12, kind: output, shape index: {0}]   ;;  %s2331_s13 = inlined_call_operand.vmem [shape: f32[16,2], index: 13, kind: output, shape index: {1}]  }
   0x1   :  { %2346 = sst [smem:[#allocation34_spill]] %s2318_s0 }
   0x2   :  { %2347 = sst [smem:[#allocation35_spill]] %s2319_s1 }
   0x3   :  { %2348 = sst [smem:[#allocation36_spill]] %s2321_s3 }
   0x4   :  { %2349 = sst [smem:[#allocation37_spill]] %s2323_s5 }
   0x5   :  { %2350 = sst [smem:[#allocation38_spill]] %s2324_s6 }
   0x6   :  { %2351 = sst [smem:[#allocation39_spill]] %s2326_s8 }
   0x7   :  { %2352 = sst [smem:[#allocation40_spill]] %s2330_s12 }
   0x8   :  { %2353 = sst [smem:[#allocation41_spill]] %s2331_s13 }
   0x9   :  { %19 = vsyncpa [#allocation3], 0 }
   0xa   :  { %21 = vsyncpa [#allocation3 + $0x1], 0 }
   0xb   :  { %22 = vsyncpa [#allocation6], 0 }
   0xc   :  { %24 = vsyncpa [#allocation6 + $0x1], 0 }
   0xd   :  { %25 = vsyncpa [#allocation9], 0 }
   0xe   :  { %27 = vsyncpa [#allocation9 + $0x1], 0 }
   0xf   :  { %28 = vsyncpa [#allocation12], 0 }
  0x10   :  { %30 = vsyncpa [#allocation12 + $0x1], 0 }
  0x11   :  { %31 = vsyncpa [#allocation15], 0 }
  0x12   :  { %33 = vsyncpa [#allocation15 + $0x1], 0 }
  0x13   :  { %34 = vsyncpa [#allocation18], 0 }
  0x14   :  { %36 = vsyncpa [#allocation18 + $0x1], 0 }
  0x15   :  { %37 = vsyncpa [#allocation4], 0 }
  0x16   :  { %39 = vsyncpa [#allocation4 + $0x1], 0  ;;  %s1835_s25 = smov 0   ;;  %s1837_s26 = smov 0  }
  0x17   :  { %s1839_s27 = smov 0   ;;  %s1841_s28 = smov 0  }
  0x18 LB: > { %2354 = sst [smem:[#allocation27_spill]] %s1737_s25  ;;  %s1856_s29 = sadd.s32 4294967295, %s1749_s28   ;;  %s1749_s28 = sphi %s1841_s28, %s2402_s28   ;;  %s1745_s27 = sphi %s1839_s27, %s2404_s27   ;;  %s1741_s26 = sphi %s1837_s26, %s2406_s26   ;;  %s1737_s25 = sphi %s1835_s25, %s2405_s25  }
  0x19   : > { %2355 = sst [smem:[#allocation28_spill]] %s1745_s27  ;;  %s1227_s30 = sadd.s32 4294967294, %s1749_s28  }
  0x1a   : > { %2356 = sst [smem:[#allocation29_spill]] %s1749_s28  ;;  %s1860_s14 = sadd.s32 1, %s1749_s28  }
  0x1b   : > { %2357 = sst [smem:[#allocation30_spill]] %s1860_s14  ;;  %s52_s15 = sadd.s32 1, %s1745_s27 }
  0x1c   : > { %s49_s16 = ssub.s32 %s1749_s28, %s1860_s14  ;;  %p59_p0 = scmp.ne.s32.totalorder %s1745_s27, %s1741_s26 }
  0x1d   : > { %p50_p1 = scmp.eq.s32.totalorder %s49_s16, 0  ;;  %p60_p2 = scmp.eq.s32.totalorder %s1749_s28, 0 }
  0x1e   : > { %p65_p3 = scmp.ne.s32.totalorder %s1741_s26, %s1737_s25  ;;  %p66_p4 = scmp.eq.s32.totalorder %s1856_s29, 0 }
  0x1f   : > { %s1872_s17 = scalar_select %p50_p1, %s1745_s27, %s52_s15  }
  0x20   : > { %p61_p5 = por %p60_p2, %p59_p0  ;;  %p1874_p6 = por %p66_p4, %p65_p3 }
  0x21   : > { %2358 = sst [smem:[#allocation31_spill]] %s1872_s17  ;;  %p375_p7 = scmp.eq.s32.totalorder %s1856_s29, 1 }
  0x22   : > { %s2359_s18 = scalar_select %p1874_p6, 1, 0 }
  0x23   : > { %p381_p8 = scmp.eq.s32.totalorder %s1227_s30, 1  ;;  %p1326_p10 = scmp.lt.s32.totalorder %s1749_s28, 2 }
  0x24   : > { %p1881_p11 = por %p375_p7, %p59_p0  ;;  %s1890_s21 = sand.u32 1, %s1745_s27  }
  0x25   : > { %p1885_p12 = por %p381_p8, %p65_p3  ;;  %s1893_s22 = sshll.u32 %s1749_s28, 7 }
  0x26   : > { %s2360_s19 = scalar_select %p1881_p11, 1, 0 }
  0x27   : > { %s2362_s20 = scalar_select %p1885_p12, 1, 0 }
  0x28   : > { %2361 = sst [smem:[#allocation32_spill]] %s2360_s19  ;;  %s1896_s23 = sshll.u32 %s1890_s21, 3 }
  0x29   : > { %2363 = sst [smem:[#allocation33_spill]] %s2362_s20  ;;  %p1898_p13 = pnand %p1326_p10, %p61_p5 }
  0x2a   : > { %s1903_s30 = sand.u32 1, %s1749_s28   ;;  %s2365_s1 = sld [smem:[#allocation35_spill]] }
  0x2b   : > { %s2364_s24 = scalar_select %p1898_p13, 1, 0 }
  0x2c   : > { %s449_s27 = scalar_lea.vmem [#allocation5], %s1896_s23  ;;  %p1920_p2 = pneg %p1898_p13 }
  0x2d   : > { %s456_s14 = sshll.u32 %s449_s27, 4  ;;  %s1912_s14 = int_to_ptr.vmem [resolvable:$true] %s456_s14 }
  0x30   : > { %s1909_s17 = scalar_lea.hbm %s2365_s1, %s1893_s22  ;;  %s1368_s19 = scalar_lea.hbm %s2365_s1, 256 }
  0x31   : > { %s1363_s25 = scalar_lea.hbm %s1909_s17, 128  ;;  %p1369_p5 = scmp.lt.u32.totalorder %s1909_s17, %s2365_s1 }
  0x32   : > { %p1364_p1 = scmp.ne.s32.totalorder %s1909_s17, %s1363_s25  ;;  %p1370_p7 = scmp.lt.u32.totalorder %s1368_s19, %s1363_s25 }
  0x33   : > { %p1372_p10 = scmp.lt.u32.totalorder %s1363_s25, %s1909_s17 }
  0x34   : > { %p1366_p3 = pnand %p1920_p2, %p1364_p1  ;;  %p1371_p8 = por %p1370_p7, %p1369_p5 }
  0x36   : > { %p1367_p4 = pneg %p1366_p3  ;;  %p1373_p9 = por %p1372_p10, %p1371_p8 }
  0x38   : > { %p1374_p0 = pnand %p1373_p9, %p1367_p4 }
  0x3a   : > { %1377 = shalt.err (!%p1374_p0)
}
  0x3b   : > { %s1378_s20 = scalar_lea.vmem %s1912_s14, 128  ;;  %s1751_s15 = smov [#allocation5]  }
  0x3c   : > { %p1379_p1 = scmp.ne.s32.totalorder %s1912_s14, %s1378_s20  ;;  %s1383_s16 = sshll.u32 %s1751_s15, 4  ;;  %s1384_s16 = int_to_ptr.vmem [resolvable:$false] %s1383_s16 }
  0x3d   : > { %s1385_s13 = scalar_lea.vmem %s1384_s16, 256  ;;  %p1386_p11 = scmp.lt.s32.totalorder %s1912_s14, %s1384_s16 }
  0x3e   : > { %p1381_p3 = pnand %p1379_p1, %p1920_p2  ;;  %p1387_p6 = scmp.lt.s32.totalorder %s1385_s13, %s1378_s20 }
  0x40   : > { %p1382_p12 = pneg %p1381_p3  ;;  %p1388_p5 = por %p1387_p6, %p1386_p11 }
  0x42   : > { %p1389_p7 = pnand %p1388_p5, %p1382_p12 }
  0x44   : > { %1392 = shalt.err (!%p1389_p7)
}
  0x45   : > { %s2367_s25 = scalar_lea.sflag [#allocation6], %s1903_s30  ;;  %p619_p9 = scmp.lt.s32.totalorder %s1749_s28, 3 }
  0x46   : > { %1297 = dma.hbm_to_vmem [thread:$0]  (!%p1898_p13), %s1909_s17, 128, %s1912_s14, %s2367_s25  }
  0x47   : > { %s2368_s3 = sld [smem:[#allocation36_spill]]  ;;  %p2369_p6 = scmp.ge.s32.totalorder %s1749_s28, 1 }
  0x48   : > { %s485_s16 = scalar_lea.vmem [#allocation8], %s1896_s23 }
  0x49   : > { %p1954_p11 = pnand %p2369_p6, %p619_p9  ;;  %s492_s13 = sshll.u32 %s485_s16, 4  ;;  %s493_s13 = int_to_ptr.vmem [resolvable:$true] %s492_s13 }
  0x4b   : > { %s2370_s15 = scalar_select %p1954_p11, 1, 0 }
  0x4d   : > { %s1950_s20 = scalar_lea.hbm %s2368_s3, %s1893_s22  ;;  %s1398_s19 = scalar_lea.hbm %s2368_s3, 256 }
  0x4e   : > { %s1393_s14 = scalar_lea.hbm %s1950_s20, 128  ;;  %p1399_p8 = scmp.lt.u32.totalorder %s1950_s20, %s2368_s3 }
  0x4f   : > { %p1394_p12 = scmp.ne.s32.totalorder %s1950_s20, %s1393_s14  ;;  %p1400_p10 = scmp.lt.u32.totalorder %s1398_s19, %s1393_s14 }
  0x50   : > { %p1402_p3 = scmp.lt.u32.totalorder %s1393_s14, %s1950_s20 }
  0x51   : > { %p1396_p0 = pnand %p1394_p12, %p1920_p2  ;;  %p1401_p1 = por %p1400_p10, %p1399_p8 }
  0x53   : > { %p1397_p4 = pneg %p1396_p0  ;;  %p1403_p5 = por %p1402_p3, %p1401_p1 }
  0x55   : > { %p1404_p7 = pnand %p1403_p5, %p1397_p4 }
  0x57   : > { %1407 = shalt.err (!%p1404_p7)
}
  0x58   : > { %s1408_s16 = scalar_lea.vmem %s493_s13, 128  ;;  %s1752_s1 = smov [#allocation8]  }
  0x59   : > { %p1409_p9 = scmp.ne.s32.totalorder %s493_s13, %s1408_s16  ;;  %s1413_s5 = sshll.u32 %s1752_s1, 4  ;;  %s1414_s5 = int_to_ptr.vmem [resolvable:$false] %s1413_s5 }
  0x5a   : > { %s1415_s17 = scalar_lea.vmem %s1414_s5, 256  ;;  %p1416_p0 = scmp.lt.s32.totalorder %s493_s13, %s1414_s5 }
  0x5b   : > { %p1411_p6 = pnand %p1409_p9, %p1920_p2  ;;  %p1417_p11 = scmp.lt.s32.totalorder %s1415_s17, %s1408_s16 }
  0x5d   : > { %p1412_p12 = pneg %p1411_p6  ;;  %p1418_p13 = por %p1417_p11, %p1416_p0 }
  0x5f   : > { %p1419_p8 = pnand %p1418_p13, %p1412_p12 }
  0x61   : > { %1422 = shalt.err (!%p1419_p8)
}
  0x62   : > { %p2371_p10 = scmp.ne.s32.totalorder %s2364_s24, 0  ;;  %s2372_s28 = scalar_lea.sflag [#allocation9], %s1903_s30 }
  0x63   : > { %s2373_s6 = sld [smem:[#allocation38_spill]]  ;;  %s528_s5 = scalar_lea.vmem [#allocation11], %s1896_s23 }
  0x64   : > { %1303 = dma.hbm_to_vmem [thread:$0]  (!%p2371_p10), %s1950_s20, 128, %s493_s13, %s2372_s28  }
  0x65   : > { %s535_s19 = sshll.u32 %s528_s5, 4  ;;  %s536_s19 = int_to_ptr.vmem [resolvable:$true] %s535_s19 }
  0x69   : > { %s1983_s1 = scalar_lea.hbm %s2373_s6, %s1893_s22  ;;  %s1428_s13 = scalar_lea.hbm %s2373_s6, 256 }
  0x6a   : > { %s1423_s16 = scalar_lea.hbm %s1983_s1, 128  ;;  %p1429_p1 = scmp.lt.u32.totalorder %s1983_s1, %s2373_s6 }
  0x6b   : > { %p1424_p13 = scmp.ne.s32.totalorder %s1983_s1, %s1423_s16  ;;  %p1430_p3 = scmp.lt.u32.totalorder %s1428_s13, %s1423_s16 }
  0x6c   : > { %p1432_p7 = scmp.lt.u32.totalorder %s1423_s16, %s1983_s1 }
  0x6d   : > { %p1426_p11 = pnand %p1424_p13, %p1920_p2  ;;  %p1431_p5 = por %p1430_p3, %p1429_p1 }
  0x6f   : > { %p1427_p4 = pneg %p1426_p11  ;;  %p1433_p9 = por %p1432_p7, %p1431_p5 }
  0x71   : > { %p1434_p6 = pnand %p1433_p9, %p1427_p4 }
  0x73   : > { %1437 = shalt.err (!%p1434_p6)
}
  0x74   : > { %s1438_s25 = scalar_lea.vmem %s536_s19, 128  ;;  %s1753_s5 = smov [#allocation11]  }
  0x75   : > { %p1439_p12 = scmp.ne.s32.totalorder %s536_s19, %s1438_s25  ;;  %s1443_s27 = sshll.u32 %s1753_s5, 4  ;;  %s1444_s27 = int_to_ptr.vmem [resolvable:$false] %s1443_s27 }
  0x76   : > { %s1445_s17 = scalar_lea.vmem %s1444_s27, 256  ;;  %p1446_p13 = scmp.lt.s32.totalorder %s536_s19, %s1444_s27 }
  0x77   : > { %p1441_p0 = pnand %p1439_p12, %p1920_p2  ;;  %p1447_p11 = scmp.lt.s32.totalorder %s1445_s17, %s1438_s25 }
  0x79   : > { %p1442_p8 = pneg %p1441_p0  ;;  %p1448_p10 = por %p1447_p11, %p1446_p13 }
  0x7b   : > { %p1449_p1 = pnand %p1448_p10, %p1442_p8 }
  0x7d   : > { %1452 = shalt.err (!%p1449_p1)
}
  0x7e   : > { %p2374_p3 = scmp.ne.s32.totalorder %s2364_s24, 0  ;;  %s2375_s16 = scalar_lea.sflag [#allocation12], %s1903_s30 }
  0x7f   : > { %s2376_s8 = sld [smem:[#allocation39_spill]]  ;;  %s564_s27 = scalar_lea.vmem [#allocation14], %s1896_s23 }
  0x80   : > { %1309 = dma.hbm_to_vmem [thread:$0]  (!%p2374_p3), %s1983_s1, 128, %s536_s19, %s2375_s16  }
  0x81   : > { %s571_s14 = sshll.u32 %s564_s27, 4  ;;  %s572_s14 = int_to_ptr.vmem [resolvable:$true] %s571_s14 }
  0x85   : > { %s2010_s28 = scalar_lea.hbm %s2376_s8, %s1893_s22  ;;  %s1458_s19 = scalar_lea.hbm %s2376_s8, 256 }
  0x86   : > { %s1453_s5 = scalar_lea.hbm %s2010_s28, 128  ;;  %p1459_p7 = scmp.lt.u32.totalorder %s2010_s28, %s2376_s8 }
  0x87   : > { %p1454_p10 = scmp.ne.s32.totalorder %s2010_s28, %s1453_s5  ;;  %p1460_p9 = scmp.lt.u32.totalorder %s1458_s19, %s1453_s5 }
  0x88   : > { %p1462_p12 = scmp.lt.u32.totalorder %s1453_s5, %s2010_s28 }
  0x89   : > { %p1456_p4 = pnand %p1454_p10, %p1920_p2  ;;  %p1461_p6 = por %p1460_p9, %p1459_p7 }
  0x8b   : > { %p1457_p5 = pneg %p1456_p4  ;;  %p1463_p0 = por %p1462_p12, %p1461_p6 }
  0x8d   : > { %p1464_p8 = pnand %p1463_p0, %p1457_p5 }
  0x8f   : > { %1467 = shalt.err (!%p1464_p8)
}
  0x90   : > { %s1468_s13 = scalar_lea.vmem %s572_s14, 128  ;;  %s1754_s27 = smov [#allocation14]  }
  0x91   : > { %p1469_p13 = scmp.ne.s32.totalorder %s572_s14, %s1468_s13  ;;  %s1473_s25 = sshll.u32 %s1754_s27, 4  ;;  %s1474_s25 = int_to_ptr.vmem [resolvable:$false] %s1473_s25 }
  0x92   : > { %s1475_s17 = scalar_lea.vmem %s1474_s25, 256  ;;  %p1476_p10 = scmp.lt.s32.totalorder %s572_s14, %s1474_s25 }
  0x93   : > { %p1471_p11 = pnand %p1469_p13, %p1920_p2  ;;  %p1477_p4 = scmp.lt.s32.totalorder %s1475_s17, %s1468_s13 }
  0x95   : > { %p1472_p1 = pneg %p1471_p11  ;;  %p1478_p3 = por %p1477_p4, %p1476_p10 }
  0x97   : > { %p1479_p7 = pnand %p1478_p3, %p1472_p1 }
  0x99   : > { %1482 = shalt.err (!%p1479_p7)
}
  0x9a   : > { %p2377_p9 = scmp.ne.s32.totalorder %s2364_s24, 0  ;;  %s2378_s5 = scalar_lea.sflag [#allocation15], %s1903_s30 }
  0x9b   : > { %s2379_s0 = sld [smem:[#allocation34_spill]]  ;;  %s431_s25 = scalar_lea.vmem [#allocation2], %s1896_s23 }
  0x9c   : > { %1315 = dma.hbm_to_vmem [thread:$0]  (!%p2377_p9), %s2010_s28, 128, %s572_s14, %s2378_s5  }
  0x9d   : > { %s438_s20 = sshll.u32 %s431_s25, 4  ;;  %s2046_s17 = scalar_lea.hbm %s2320_s2, %s1893_s22  ;;  %s2040_s20 = int_to_ptr.vmem [resolvable:$true] %s438_s20 }
  0x9e   : > { %s428_s3 = scalar_lea.sflag [#allocation3], %s1890_s21 }
  0xa1   : > { %s2037_s16 = scalar_lea.hbm %s2379_s0, %s1893_s22  ;;  %s1488_s1 = scalar_lea.hbm %s2379_s0, 256 }
  0xa2   : > { %s1483_s28 = scalar_lea.hbm %s2037_s16, 128  ;;  %p1489_p12 = scmp.lt.u32.totalorder %s2037_s16, %s2379_s0 }
  0xa3   : > { %p1484_p3 = scmp.ne.s32.totalorder %s2037_s16, %s1483_s28  ;;  %p1490_p0 = scmp.lt.u32.totalorder %s1488_s1, %s1483_s28 }
  0xa4   : > { %p1492_p13 = scmp.lt.u32.totalorder %s1483_s28, %s2037_s16 }
  0xa5   : > { %p1486_p5 = pnand %p1484_p3, %p1920_p2  ;;  %p1491_p8 = por %p1490_p0, %p1489_p12 }
  0xa7   : > { %p1487_p6 = pneg %p1486_p5  ;;  %p1493_p11 = por %p1492_p13, %p1491_p8 }
  0xa9   : > { %p1494_p1 = pnand %p1493_p11, %p1487_p6 }
  0xab   : > { %1497 = shalt.err (!%p1494_p1)
}
  0xac   : > { %s1498_s25 = scalar_lea.vmem %s2040_s20, 128  ;;  %s1755_s13 = smov [#allocation2]  }
  0xad   : > { %p1499_p10 = scmp.ne.s32.totalorder %s2040_s20, %s1498_s25  ;;  %s1503_s27 = sshll.u32 %s1755_s13, 4  ;;  %s1504_s27 = int_to_ptr.vmem [resolvable:$false] %s1503_s27 }
  0xae   : > { %s1505_s6 = scalar_lea.vmem %s1504_s27, 256  ;;  %p1506_p3 = scmp.lt.s32.totalorder %s2040_s20, %s1504_s27 }
  0xaf   : > { %p1501_p4 = pnand %p1499_p10, %p1920_p2  ;;  %p1507_p5 = scmp.lt.s32.totalorder %s1505_s6, %s1498_s25 }
  0xb1   : > { %p1502_p7 = pneg %p1501_p4  ;;  %p1508_p12 = por %p1507_p5, %p1506_p3 }
  0xb3   : > { %p1509_p0 = pnand %p1508_p12, %p1502_p7 }
  0xb5   : > { %1512 = shalt.err (!%p1509_p0)
}
  0xb6   : > { %1294 = dma.hbm_to_vmem [thread:$0]  (!%p2377_p9), %s2037_s16, 128, %s2040_s20, %s428_s3  }
  0xb7   : > { %s467_s28 = scalar_lea.vmem [#allocation7], %s1896_s23  ;;  %s2075_s19 = scalar_lea.hbm %s2322_s4, %s1893_s22 }
  0xb8   : > { %s474_s14 = sshll.u32 %s467_s28, 4  ;;  %s1513_s25 = scalar_lea.hbm %s2046_s17, 128  ;;  %s475_s14 = int_to_ptr.vmem [resolvable:$true] %s474_s14 }
  0xb9   : > { %p1514_p6 = scmp.ne.s32.totalorder %s2046_s17, %s1513_s25  ;;  %s1518_s6 = scalar_lea.hbm %s2320_s2, 256 }
  0xba   : > { %p1519_p11 = scmp.lt.u32.totalorder %s2046_s17, %s2320_s2  ;;  %p1520_p1 = scmp.lt.u32.totalorder %s1518_s6, %s1513_s25 }
  0xbb   : > { %p1516_p8 = pnand %p1514_p6, %p1920_p2  ;;  %p1522_p4 = scmp.lt.u32.totalorder %s1513_s25, %s2046_s17 }
  0xbc   : > { %p1521_p10 = por %p1520_p1, %p1519_p11 }
  0xbd   : > { %p1517_p13 = pneg %p1516_p8 }
  0xbe   : > { %p1523_p7 = por %p1522_p4, %p1521_p10 }
  0xc0   : > { %p1524_p3 = pnand %p1523_p7, %p1517_p13 }
  0xc2   : > { %1527 = shalt.err (!%p1524_p3)
}
  0xc3   : > { %s1528_s3 = scalar_lea.vmem %s475_s14, 128  ;;  %s1756_s16 = smov [#allocation7]  }
  0xc4   : > { %p1529_p5 = scmp.ne.s32.totalorder %s475_s14, %s1528_s3  ;;  %s1533_s20 = sshll.u32 %s1756_s16, 4  ;;  %s1534_s20 = int_to_ptr.vmem [resolvable:$false] %s1533_s20 }
  0xc5   : > { %s1535_s28 = scalar_lea.vmem %s1534_s20, 256  ;;  %p1536_p6 = scmp.lt.s32.totalorder %s475_s14, %s1534_s20 }
  0xc6   : > { %p1531_p12 = pnand %p1529_p5, %p1920_p2  ;;  %p1537_p8 = scmp.lt.s32.totalorder %s1535_s28, %s1528_s3 }
  0xc8   : > { %p1532_p0 = pneg %p1531_p12  ;;  %p1538_p9 = por %p1537_p8, %p1536_p6 }
  0xca   : > { %p1539_p1 = pnand %p1538_p9, %p1532_p0 }
  0xcc   : > { %1542 = shalt.err (!%p1539_p1)
}
  0xcd   : > { %p2380_p11 = scmp.ne.s32.totalorder %s2364_s24, 0  ;;  %s2381_s0 = scalar_lea.sflag [#allocation6], %s1903_s30 }
  0xce   : > { %s503_s8 = scalar_lea.vmem [#allocation10], %s1896_s23  ;;  %s2101_s13 = scalar_lea.hbm %s2325_s7, %s1893_s22 }
  0xcf   : > { %1300 = dma.hbm_to_vmem [thread:$0]  (!%p2380_p11), %s2046_s17, 128, %s475_s14, %s2381_s0  }
  0xd0   : > { %s510_s5 = sshll.u32 %s503_s8, 4  ;;  %s1543_s27 = scalar_lea.hbm %s2075_s19, 128  ;;  %s511_s5 = int_to_ptr.vmem [resolvable:$true] %s510_s5 }
  0xd1   : > { %p1544_p9 = scmp.ne.s32.totalorder %s2075_s19, %s1543_s27  ;;  %s1548_s16 = scalar_lea.hbm %s2322_s4, 256 }
  0xd2   : > { %p1549_p4 = scmp.lt.u32.totalorder %s2075_s19, %s2322_s4  ;;  %p1550_p7 = scmp.lt.u32.totalorder %s1548_s16, %s1543_s27 }
  0xd3   : > { %p1546_p13 = pnand %p1544_p9, %p1920_p2  ;;  %p1552_p5 = scmp.lt.u32.totalorder %s1543_s27, %s2075_s19 }
  0xd4   : > { %p1551_p3 = por %p1550_p7, %p1549_p4 }
  0xd5   : > { %p1547_p10 = pneg %p1546_p13 }
  0xd6   : > { %p1553_p12 = por %p1552_p5, %p1551_p3 }
  0xd8   : > { %p1554_p0 = pnand %p1553_p12, %p1547_p10 }
  0xda   : > { %1557 = shalt.err (!%p1554_p0)
}
  0xdb   : > { %s1558_s17 = scalar_lea.vmem %s511_s5, 128  ;;  %s1757_s14 = smov [#allocation10]  }
  0xdc   : > { %p1559_p6 = scmp.ne.s32.totalorder %s511_s5, %s1558_s17  ;;  %s1563_s0 = sshll.u32 %s1757_s14, 4  ;;  %s1564_s0 = int_to_ptr.vmem [resolvable:$false] %s1563_s0 }
  0xdd   : > { %s1565_s8 = scalar_lea.vmem %s1564_s0, 256  ;;  %p1566_p9 = scmp.lt.s32.totalorder %s511_s5, %s1564_s0 }
  0xde   : > { %p1561_p8 = pnand %p1559_p6, %p1920_p2  ;;  %p1567_p13 = scmp.lt.s32.totalorder %s1565_s8, %s1558_s17 }
  0xe0   : > { %p1562_p1 = pneg %p1561_p8  ;;  %p1568_p11 = por %p1567_p13, %p1566_p9 }
  0xe2   : > { %p1569_p4 = pnand %p1568_p11, %p1562_p1 }
  0xe4   : > { %1572 = shalt.err (!%p1569_p4)
}
  0xe5   : > { %p2382_p7 = scmp.ne.s32.totalorder %s2364_s24, 0  ;;  %s2383_s1 = scalar_lea.sflag [#allocation9], %s1903_s30 }
  0xe6   : > { %s546_s25 = scalar_lea.vmem [#allocation13], %s1896_s23  ;;  %s2127_s16 = scalar_lea.hbm %s2328_s10, %s1893_s22 }
  0xe7   : > { %1306 = dma.hbm_to_vmem [thread:$0]  (!%p2382_p7), %s2075_s19, 128, %s511_s5, %s2383_s1  }
  0xe8   : > { %s553_s27 = sshll.u32 %s546_s25, 4  ;;  %s1573_s20 = scalar_lea.hbm %s2101_s13, 128  ;;  %s554_s27 = int_to_ptr.vmem [resolvable:$true] %s553_s27 }
  0xe9   : > { %p1574_p11 = scmp.ne.s32.totalorder %s2101_s13, %s1573_s20  ;;  %s1578_s14 = scalar_lea.hbm %s2325_s7, 256 }
  0xea   : > { %p1579_p5 = scmp.lt.u32.totalorder %s2101_s13, %s2325_s7  ;;  %p1580_p12 = scmp.lt.u32.totalorder %s1578_s14, %s1573_s20 }
  0xeb   : > { %p1576_p10 = pnand %p1574_p11, %p1920_p2  ;;  %p1582_p6 = scmp.lt.u32.totalorder %s1573_s20, %s2101_s13 }
  0xec   : > { %p1581_p0 = por %p1580_p12, %p1579_p5 }
  0xed   : > { %p1577_p3 = pneg %p1576_p10 }
  0xee   : > { %p1583_p8 = por %p1582_p6, %p1581_p0 }
  0xf0   : > { %p1584_p1 = pnand %p1583_p8, %p1577_p3 }
  0xf2   : > { %1587 = shalt.err (!%p1584_p1)
}
  0xf3   : > { %s1588_s19 = scalar_lea.vmem %s554_s27, 128  ;;  %s1758_s5 = smov [#allocation13]  }
  0xf4   : > { %p1589_p9 = scmp.ne.s32.totalorder %s554_s27, %s1588_s19  ;;  %s1593_s1 = sshll.u32 %s1758_s5, 4  ;;  %s1594_s1 = int_to_ptr.vmem [resolvable:$false] %s1593_s1 }
  0xf5   : > { %s1595_s25 = scalar_lea.vmem %s1594_s1, 256  ;;  %p1596_p11 = scmp.lt.s32.totalorder %s554_s27, %s1594_s1 }
  0xf6   : > { %p1591_p13 = pnand %p1589_p9, %p1920_p2  ;;  %p1597_p10 = scmp.lt.s32.totalorder %s1595_s25, %s1588_s19 }
  0xf8   : > { %p1592_p4 = pneg %p1591_p13  ;;  %p1598_p7 = por %p1597_p10, %p1596_p11 }
  0xfa   : > { %p1599_p5 = pnand %p1598_p7, %p1592_p4 }
  0xfc   : > { %1602 = shalt.err (!%p1599_p5)
}
  0xfd   : > { %p2384_p12 = scmp.ne.s32.totalorder %s2364_s24, 0  ;;  %s2385_s6 = scalar_lea.sflag [#allocation12], %s1903_s30 }
  0xfe   : > { %s589_s3 = scalar_lea.vmem [#allocation16], %s1896_s23  ;;  %s1603_s28 = scalar_lea.hbm %s2127_s16, 128 }
  0xff   : > { %1312 = dma.hbm_to_vmem [thread:$0]  (!%p2384_p12), %s2101_s13, 128, %s554_s27, %s2385_s6  }
 0x100   : > { %s596_s20 = sshll.u32 %s589_s3, 4  ;;  %p1604_p3 = scmp.ne.s32.totalorder %s2127_s16, %s1603_s28  ;;  %s597_s20 = int_to_ptr.vmem [resolvable:$true] %s596_s20 }
 0x101   : > { %s1608_s0 = scalar_lea.hbm %s2328_s10, 256  ;;  %p1609_p6 = scmp.lt.u32.totalorder %s2127_s16, %s2328_s10 }
 0x102   : > { %p1606_p7 = pnand %p1604_p3, %p1920_p2  ;;  %p1610_p8 = scmp.lt.u32.totalorder %s1608_s0, %s1603_s28 }
 0x103   : > { %p1612_p9 = scmp.lt.u32.totalorder %s1603_s28, %s2127_s16 }
 0x104   : > { %p1607_p0 = pneg %p1606_p7  ;;  %p1611_p1 = por %p1610_p8, %p1609_p6 }
 0x106   : > { %p1613_p13 = por %p1612_p9, %p1611_p1 }
 0x108   : > { %p1614_p4 = pnand %p1613_p13, %p1607_p0 }
 0x10a   : > { %1617 = shalt.err (!%p1614_p4)
}
 0x10b   : > { %s1618_s13 = scalar_lea.vmem %s597_s20, 128  ;;  %s1759_s27 = smov [#allocation16]  }
 0x10c   : > { %p1619_p11 = scmp.ne.s32.totalorder %s597_s20, %s1618_s13  ;;  %s1623_s5 = sshll.u32 %s1759_s27, 4  ;;  %s1624_s5 = int_to_ptr.vmem [resolvable:$false] %s1623_s5 }
 0x10d   : > { %s1625_s1 = scalar_lea.vmem %s1624_s5, 256  ;;  %p1626_p3 = scmp.lt.s32.totalorder %s597_s20, %s1624_s5 }
 0x10e   : > { %p1621_p10 = pnand %p1619_p11, %p1920_p2  ;;  %p1627_p7 = scmp.lt.s32.totalorder %s1625_s1, %s1618_s13 }
 0x110   : > { %p1622_p5 = pneg %p1621_p10  ;;  %p1628_p12 = por %p1627_p7, %p1626_p3 }
 0x112   : > { %p1629_p6 = pnand %p1628_p12, %p1622_p5 }
 0x114   : > { %1632 = shalt.err (!%p1629_p6)
}
 0x115   : > { %p2386_p8 = scmp.ne.s32.totalorder %s2364_s24, 0  ;;  %s2387_s25 = scalar_lea.sflag [#allocation15], %s1903_s30 }
 0x116   : > { %s2172_s28 = scalar_lea.hbm %s2329_s11, %s1893_s22  ;;  %s607_s17 = scalar_lea.vmem [#allocation17], %s1896_s23 }
 0x117   : > { %1318 = dma.hbm_to_vmem [thread:$0]  (!%p2386_p8), %s2127_s16, 128, %s597_s20, %s2387_s25  }
 0x118   : > { %s614_s14 = sshll.u32 %s607_s17, 4  ;;  %s604_s0 = scalar_lea.sflag [#allocation18], %s1890_s21  ;;  %s615_s14 = int_to_ptr.vmem [resolvable:$true] %s614_s14 }
 0x119   : > { %s1633_s30 = scalar_lea.hbm %s2172_s28, 128  ;;  %s1638_s20 = scalar_lea.hbm %s2329_s11, 256 }
 0x11a   : > { %p1634_p12 = scmp.ne.s32.totalorder %s2172_s28, %s1633_s30  ;;  %p1639_p9 = scmp.lt.u32.totalorder %s2172_s28, %s2329_s11 }
 0x11b   : > { %p1640_p13 = scmp.lt.u32.totalorder %s1638_s20, %s1633_s30  ;;  %p1642_p11 = scmp.lt.u32.totalorder %s1633_s30, %s2172_s28 }
 0x11c   : > { %p1636_p0 = pnand %p1634_p12, %p1920_p2 }
 0x11d   : > { %p1641_p4 = por %p1640_p13, %p1639_p9 }
 0x11e   : > { %p1637_p1 = pneg %p1636_p0 }
 0x11f   : > { %p1643_p10 = por %p1642_p11, %p1641_p4 }
 0x121   : > { %p1644_p5 = pnand %p1643_p10, %p1637_p1 }
 0x123   : > { %1647 = shalt.err (!%p1644_p5)
}
 0x124   : > { %s1648_s21 = scalar_lea.vmem %s615_s14, 128  ;;  %s1760_s23 = smov [#allocation17]  }
 0x125   : > { %p1649_p3 = scmp.ne.s32.totalorder %s615_s14, %s1648_s21  ;;  %s1653_s13 = sshll.u32 %s1760_s23, 4  ;;  %s1654_s13 = int_to_ptr.vmem [resolvable:$false] %s1653_s13 }
 0x126   : > { %s1655_s27 = scalar_lea.vmem %s1654_s13, 256  ;;  %p1656_p12 = scmp.lt.s32.totalorder %s615_s14, %s1654_s13 }
 0x127   : > { %p1651_p7 = pnand %p1649_p3, %p1920_p2  ;;  %p1657_p0 = scmp.lt.s32.totalorder %s1655_s27, %s1648_s21 }
 0x129   : > { %p1652_p6 = pneg %p1651_p7  ;;  %p1658_p8 = por %p1657_p0, %p1656_p12 }
 0x12b   : > { %p1659_p9 = pnand %p1658_p8, %p1652_p6 }
 0x12d   : > { %1662 = shalt.err (!%p1659_p9)
}
 0x12e   : > { %p2388_p13 = scmp.ne.s32.totalorder %s2364_s24, 0  ;;  %p2389_p1 = scmp.ne.s32.totalorder %s2370_s15, 0 }
 0x12f   : > { %s2196_s12 = sand.u32 (!%p2389_p1), 1, %s1741_s26   ;;  %p2390_p2 = scmp.ne.s32.totalorder (!%p2389_p1), %s2359_s18, 0 }
 0x130   : > { %1321 = dma.hbm_to_vmem [thread:$0]  (!%p2388_p13), %s2172_s28, 128, %s615_s14, %s604_s0  }
 0x131   : > { %623 = sbr.rel (%p2389_p1) target bundleno = 681 (0x2a9), region = 68  ;;  %s2199_s5 = sshll.u32 (!%p2389_p1), %s2196_s12, 3 }
 0x132   : > { %s626_s1 = scalar_lea.sflag (!%p2389_p1), [#allocation3], %s2196_s12  ;;  %s629_s25 = scalar_lea.vmem (!%p2389_p1), [#allocation2], %s2199_s5 }
 0x138   : > { %1708 = dma.done.wait (%p2390_p2), %s626_s1, 128  }
 0x139   : > { %1710 = vsyncadd (%p2390_p2), %s626_s1, 4294967168  ;;  %s634_s24 = sand.u32 1, %s1856_s29   ;;  %s638_s6 = scalar_lea.vmem [#allocation5], %s2199_s5 }
 0x13a   : > { %s635_s15 = scalar_lea.sflag [#allocation6], %s634_s24 }
 0x13b   : > { %1712 = dma.done.wait (%p2390_p2), %s635_s15, 256  }
 0x13c   : > { %1714 = vsyncadd (%p2390_p2), %s635_s15, 4294967040  ;;  %s647_s3 = scalar_lea.vmem [#allocation7], %s2199_s5  ;;  %s653_s28 = scalar_lea.sflag [#allocation9], %s634_s24 }
 0x13d   : > { %s656_s17 = scalar_lea.vmem [#allocation8], %s2199_s5 }
 0x13e   : > { %1716 = dma.done.wait (%p2390_p2), %s653_s28, 256  }
 0x13f   : > { %1718 = vsyncadd (%p2390_p2), %s653_s28, 4294967040  ;;  %s665_s14 = scalar_lea.vmem [#allocation10], %s2199_s5  ;;  %s671_s0 = scalar_lea.sflag [#allocation12], %s634_s24 }
 0x140   : > { %s674_s30 = scalar_lea.vmem [#allocation11], %s2199_s5 }
 0x141   : > { %1720 = dma.done.wait (%p2390_p2), %s671_s0, 256  }
 0x142   : > { %1722 = vsyncadd (%p2390_p2), %s671_s0, 4294967040  ;;  %s683_s8 = scalar_lea.vmem [#allocation13], %s2199_s5  ;;  %s689_s16 = scalar_lea.sflag [#allocation15], %s634_s24 }
 0x143   : > { %s692_s20 = scalar_lea.vmem [#allocation14], %s2199_s5 }
 0x144   : > { %1724 = dma.done.wait (%p2390_p2), %s689_s16, 256  }
 0x145   : > { %1726 = vsyncadd (%p2390_p2), %s689_s16, 4294967040  ;;  %s701_s19 = scalar_lea.vmem [#allocation16], %s2199_s5  ;;  %s707_s22 = scalar_lea.sflag [#allocation18], %s2196_s12 }
 0x146   : > { %s710_s21 = scalar_lea.vmem [#allocation17], %s2199_s5 }
 0x147   : > { %1728 = dma.done.wait (%p2390_p2), %s707_s22, 128  }
 0x148   : > { %1730 = vsyncadd (%p2390_p2), %s707_s22, 4294967168  ;;  %p810_p8 = scmp.lt.s32.totalorder %s1856_s29, 1  ;;  %v824_v0 = vld [vmem:[%s629_s25] sm:$0xff]  ;;  %v825_v1 = vld [vmem:[%s656_s17] sm:$0xff]  ;;  %vm827_vm0 = vcmask 261120   ;;  %s2391_s15 = sld [smem:[#allocation37_spill]] }
 0x149   : > { %v833_v2 = vld [vmem:[%s638_s6] sm:$0xff]  ;;  %v826_v3 = vmul.f32 %v825_v1, %v824_v0  ;;  %v834_v4 = vld [vmem:[%s665_s14] sm:$0xff]  ;;  %s1761_s28 = smov 64   ;;  %s1763_s17 = smov 96   ;;  %vm889_vm1 = vcmask 7168   ;;  %vm891_vm2 = vcmask 15360  }
 0x14a   : > { %s811_s23 = scalar_select %p810_p8, %s1856_s29, 1  ;;  %v841_v5 = vld [vmem:[%s674_s30] sm:$0xff]  ;;  %v835_v7 = vmul.f32 %v834_v4, %v833_v2  ;;  %v849_v9 = vld [vmem:[%s683_s8] sm:$0xff]  ;;  %vm870_vm3 = vcmask 523264   ;;  %vm872_vm4 = vcmask 785408  }
 0x14b   : > { %v850_v10 = vld [vmem:[%s701_s19] sm:$0xff]  ;;  %v828_v11 = vsel %vm827_vm0, %v826_v3, 0.0  ;;  %v823_v22 = vld [vmem:[%s710_s21] sm:$0xff]  ;;  %s2392_s30 = sld [smem:[#allocation41_spill]]  ;;  %s2393_s16 = sld [smem:[#allocation32_spill]] }
 0x14c   : > { %s2240_s13 = sshll.u32 %s811_s23, 3  ;;  %v851_v12 = vmul.f32 %v850_v10, %v849_v9  ;;  %829 = vadd.xlane.f32.xlu0 %v828_v11  ;;  %v836_v13 = vsel %vm827_vm0, %v835_v7, 0.0  ;;  %v875_v20 = vld [vmem:[%s647_s3] sm:$0xff]  ;;  %v878_v34 = vld [vmem:[%s692_s20] sm:$0xff]  ;;  %s1762_s3 = smov 32  }
 0x14d   : > { %s817_s24 = scalar_lea.vmem %s2327_s9, %s2240_s13  ;;  %837 = vadd.xlane.f32.xlu1 %v836_v13  ;;  %s1266_s20 = sshll.u32 %s1856_s29, 7 }
 0x14e   : > { %v842_v6 = vld [vmem:[%s817_s24] sm:$0xff]  ;;  %v852_v15 = vsel %vm827_vm0, %v851_v12, 0.0  ;;  %s813_s6 = scalar_lea.vmem %s2391_s15, %s2240_s13  ;;  %s803_s19 = scalar_lea.vmem [#allocation19], %s2199_s5 }
 0x14f   : > { %v843_v8 = vmul.f32 %v842_v6, %v841_v5  ;;  %v822_v16 = vld [vmem:[%s813_s6] sm:$0xff]  ;;  %s911_s22 = sshll.u32 %s803_s19, 4  ;;  %s2394_s27 = sld [smem:[#allocation40_spill]]  ;;  %s2276_s22 = int_to_ptr.vmem [resolvable:$true] %s911_s22 }
 0x150   : > { %s1663_s29 = scalar_lea.vmem %s2276_s22, 128  ;;  %s1764_s5 = smov [#allocation19]  }
 0x151   : > { %v844_v14 = vsel %vm827_vm0, %v843_v8, 0.0  ;;  %853 = vadd.xlane.f32.xlu1 %v852_v15  ;;  %s821_s8 = scalar_lea.vmem %s2392_s30, %s2240_s13  ;;  %s894_s13 = scalar_lea.sflag [#allocation4], %s2196_s12 }
 0x152   : > { %845 = vadd.xlane.f32.xlu0 %v844_v14  ;;  %p1664_p4 = scmp.ne.s32.totalorder %s2276_s22, %s1663_s29  ;;  %p2396_p11 = scmp.ne.s32.totalorder %s2393_s16, 0 }
 0x153   : > { %s1667_s18 = sshll.u32 %s1764_s5, 4  ;;  %s1668_s18 = int_to_ptr.vmem [resolvable:$false] %s1667_s18 }
 0x154   : > { %p1665_p10 = pnand %p1664_p4, %p2396_p11  ;;  %s1669_s25 = scalar_lea.vmem %s1668_s18, 256 }
 0x155   : > { %s2395_s1 = smov %s2394_s27  ;;  %s2274_s24 = scalar_lea.hbm %s2394_s27, %s1266_s20 }
 0x156   : > { %p1666_p5 = pneg %p1665_p10  ;;  %p1670_p3 = scmp.lt.s32.totalorder %s2276_s22, %s1668_s18 }
 0x157   : > { %p1671_p7 = scmp.lt.s32.totalorder %s1669_s25, %s1663_s29 }
 0x159   : > { %p1672_p6 = por %p1671_p7, %p1670_p3 }
 0x15b   : > { %p1673_p12 = pnand %p1672_p6, %p1666_p5 }
 0x1d9   : > { %v830_v17 = vpop.xlane.xlu0 %829 }
 0x1da   : > { %v831_v18 = vmul.f32 %v830_v17, %v822_v16  ;;  %v838_v19 = vpop.xlane.xlu1 %837 }
 0x1db   : > { %v839_v21 = vmul.f32 %v838_v19, %v822_v16 }
 0x1dc   : > { %v832_v23 = vadd.f32 %v831_v18, %v824_v0 }
 0x1dd   : > { %v840_v24 = vadd.f32 %v839_v21, %v833_v2 }
 0x1de   : > { %v876_v26 = vadd.f32 %v875_v20, %v832_v23  ;;  %v854_v32 = vpop.xlane.xlu1 %853 }
 0x1df   : > { %v846_v25 = vpop.xlane.xlu0 %845  ;;  %v855_v33 = vmul.f32 %v854_v32, %v823_v22 }
 0x1e0   : > { %v847_v27 = vmul.f32 %v846_v25, %v823_v22  ;;  %v877_v29 = vsub.f32 %v876_v26, %v840_v24 }
 0x1e1   : > { %v856_v36 = vadd.f32 %v855_v33, %v849_v9 }
 0x1e2   : > { %v848_v28 = vadd.f32 %v847_v27, %v841_v5  ;;  %v881_v30 = vand.u32 2147483647, %v877_v29 }
 0x1e4   : > { %862 = vrot.lane.b32.xlu1 %v848_v28, %s1761_s28  ;;  %v882_v31 = vsel %vm827_vm0, %v881_v30, 0.0  ;;  %v879_v35 = vadd.f32 %v878_v34, %v848_v28 }
 0x1e5   : > { %883 = vadd.xlane.f32.xlu0 %v882_v31 }
 0x1e6   : > { %v880_v37 = vsub.f32 %v879_v35, %v856_v36 }
 0x1e8   : > { %v885_v38 = vand.u32 2147483647, %v880_v37 }
 0x1ea   : > { %v886_v39 = vsel %vm827_vm0, %v885_v38, 0.0 }
 0x1fb   : > { %858 = vrot.lane.b32.xlu0 %v840_v24, %s1762_s3 }
 0x208   : > { %887 = vadd.xlane.f32.xlu1 %v886_v39 }
 0x219   : > { %866 = vrot.lane.b32.xlu1 %v856_v36, %s1763_s17 }
 0x256   : > { %v863_v41 = vpop.permute.xlu1 %862 }
 0x272   : > { %v884_v40 = vpop.xlane.xlu0 %883 }
 0x276   : > { %v859_v42 = vpop.permute.xlu0 %858 }
 0x277   : > { %v869_v44 = vsel %vm827_vm0, %v832_v23, %v859_v42 }
 0x278   : > { %v871_v47 = vsel %vm870_vm3, %v869_v44, %v863_v41 }
 0x295   : > { %v888_v43 = vpop.xlane.xlu1 %887 }
 0x296   : > { %v890_v45 = vsel %vm889_vm1, %v884_v40, %v888_v43 }
 0x297   : > { %892 = vst.msk [vmem:[%s821_s8] sm:$0xff] %vm891_vm2, %v890_v45 }
 0x299   : > { %v867_v46 = vpop.permute.xlu1 %866 }
 0x29a   : > { %v873_v48 = vsel %vm872_vm4, %v871_v47, %v867_v46 }
 0x29b   : > { %874 = vst [vmem:[%s803_s19] sm:$0xff] %v873_v48 }
 0x29c   : > { %1676 = shalt.err (!%p1673_p12)
}
 0x29d   : > { %s1677_s12 = scalar_lea.hbm %s2274_s24, 128  ;;  %s1681_s28 = scalar_lea.hbm %s2395_s1, 256 }
 0x29e   : > { %p1678_p0 = scmp.ne.s32.totalorder %s2274_s24, %s1677_s12  ;;  %p1682_p1 = scmp.lt.u32.totalorder %s2274_s24, %s2395_s1 }
 0x29f   : > { %p1683_p2 = scmp.lt.u32.totalorder %s1681_s28, %s1677_s12  ;;  %p1685_p4 = scmp.lt.u32.totalorder %s1677_s12, %s2274_s24 }
 0x2a0   : > { %p1679_p9 = pnand %p1678_p0, %p2396_p11 }
 0x2a1   : > { %p1684_p8 = por %p1683_p2, %p1682_p1 }
 0x2a2   : > { %p1680_p13 = pneg %p1679_p9 }
 0x2a3   : > { %p1686_p10 = por %p1685_p4, %p1684_p8 }
 0x2a5   : > { %p1687_p5 = pnand %p1686_p10, %p1680_p13 }
 0x2a7   : > { %1690 = shalt.err (!%p1687_p5)
}
 0x2a8   : > { %1289 = dma.vmem_to_hbm [thread:$0]  (%p2396_p11), %s2276_s22, 128, %s2274_s24, %s894_s13  }
 0x2a9 PF: > { %s2397_s14 = sld [smem:[#allocation27_spill]]  ;;  %s2398_s0 = sld [smem:[#allocation33_spill]] }
 0x2aa   : > { %s2399_s30 = sld [smem:[#allocation29_spill]] }
 0x2af   : > { %s926_s8 = sand.u32 1, %s2397_s14   ;;  %p2400_p3 = scmp.ne.s32.totalorder %s2398_s0, 0 }
 0x2b0   : > { %p2401_p7 = scmp.ge.s32.totalorder %s2399_s30, 2  ;;  %s927_s20 = scalar_lea.sflag [#allocation4], %s926_s8 }
 0x2b2   : > { %p1323_p6 = pnand %p2401_p7, %p2400_p3 }
 0x2b4   : > { %1732 = dma.done.wait (!%p1323_p6), %s927_s20, 128  }
 0x2b5   : > { %1734 = vsyncadd (!%p1323_p6), %s927_s20, 4294967168  ;;  %s2402_s28 = sld [smem:[#allocation30_spill]]  ;;  %s2403_s19 = sld [smem:[#allocation28_spill]] }
 0x2b6   : > { %s2404_s27 = sld [smem:[#allocation31_spill]]  ;;  %s2405_s25 = smov %s1741_s26 }
 0x2bb   : > { %p42_p12 = scmp.ge.s32.totalorder %s2402_s28, 4   ;;  %s2406_s26 = smov %s2403_s19 }
 0x2bd   :  { %44 = sbr.rel (!%p42_p12) target bundleno = 24 (0x18), region = 240 }
 0x2c4   :  { %939 = vsyncpa [#allocation3], 1 }
 0x2c5   :  { %941 = vsyncpa [#allocation3 + $0x1], 1 }
 0x2c6   :  { %942 = vsyncpa [#allocation6], 1 }
 0x2c7   :  { %944 = vsyncpa [#allocation6 + $0x1], 1 }
 0x2c8   :  { %945 = vsyncpa [#allocation9], 1 }
 0x2c9   :  { %947 = vsyncpa [#allocation9 + $0x1], 1 }
 0x2ca   :  { %948 = vsyncpa [#allocation12], 1 }
 0x2cb   :  { %950 = vsyncpa [#allocation12 + $0x1], 1 }
 0x2cc   :  { %951 = vsyncpa [#allocation15], 1 }
 0x2cd   :  { %953 = vsyncpa [#allocation15 + $0x1], 1 }
 0x2ce   :  { %954 = vsyncpa [#allocation18], 1 }
 0x2cf   :  { %956 = vsyncpa [#allocation18 + $0x1], 1 }
 0x2d0   :  { %957 = vsyncpa [#allocation4], 1 }
 0x2d1   :  { %959 = vsyncpa [#allocation4 + $0x1], 1 }

</bundles_post_ra>
